<compile_context>
chip_gen: v7x
topology: tpu7x:2x2x1
jax: 0.10.0
libtpu: 0.0.40
codegen_flags: <defaults>
</compile_context>

<pallas_src>
import math
import functools

import numpy as np
import jax
import jax.numpy as jnp
from jax.experimental import pallas as pl
from jax.experimental.pallas import tpu as pltpu


# ----------------------------------------------------------------------------
# Fused Pallas kernel: gather + PE + (selected-row) self-attention + recovery head
# ----------------------------------------------------------------------------
def _attnmove_fused_kernel(ids_ref, pos_ref, pos_batch_ref, col_batch_ref,
                           emb_ref, pe_ref, wq_ref, bq_ref, wkv_ref, bkv_ref,
                           w2_ref, b2_ref, candT_ref, out_ref,
                           *, heads, num_candidates):
    """Single-invocation kernel (no grid); every operand is a whole-array VMEM block.

    ids_ref       (B*S, 1)  int32   flattened mask_curr_traj_grid token ids
    pos_ref       (BMP, 1)  int32   mask_pos + b*S, padded to a multiple of 8 rows
    pos_batch_ref (BMP, 1)  int32   batch index of each masked row
    col_batch_ref (1, B*S)  int32   batch index of each sequence position
    emb_ref       (G, D)            embedding table (VMEM resident)
    pe_ref        (B*S, D)          positional embedding, already tiled over batch
    wq/bq         (D, D)/(1, D)     Q projection of self_attention_curr
    wkv/bkv       (D, 2D)/(1, 2D)   fused K|V projection of self_attention_curr
    w2/b2         (D, D)/(1, D)     liner_transform2
    candT_ref     (D, GCP)          emb[2:].T zero-padded to a lane-dense width
    out_ref       (BMP, GCP)        log-softmax scores (padding sliced off outside)
    """
    BS, D = pe_ref.shape
    BM = pos_ref.shape[0]                 # padded masked-row count
    G = emb_ref.shape[0]
    GCP = candT_ref.shape[1]
    dh = D // heads

    # --- embedding gather as a one-hot matmul, + positional embedding -------
    ids = ids_ref[...]                                            # (BS, 1) int32
    g_iota = jax.lax.broadcasted_iota(jnp.int32, (BS, G), 1)
    onehot = jnp.where(g_iota == ids, 1.0, 0.0)                   # (BS, G)
    x = jnp.dot(onehot, emb_ref[...],
                preferred_element_type=jnp.float32) + pe_ref[...]  # (BS, D)

    # --- mask-position row selection, hoisted before the Q projection -------
    pos = pos_ref[...]                                            # (BM, 1) int32
    s_iota = jax.lax.broadcasted_iota(jnp.int32, (BM, BS), 1)
    sel = jnp.where(s_iota == pos, 1.0, 0.0)                      # (BM, BS)
    x_sel = jnp.dot(sel, x, preferred_element_type=jnp.float32)   # (BM, D)

    # --- projections: Q only for the selected rows, fused K|V for all rows --
    q = jnp.dot(x_sel, wq_ref[...],
                preferred_element_type=jnp.float32) + bq_ref[...]       # (BM, D)
    kv = jnp.dot(x, wkv_ref[...],
                 preferred_element_type=jnp.float32) + bkv_ref[...]     # (BS, 2D)

    # block-diagonal batch mask restricted to the selected query rows
    bias = jnp.where(col_batch_ref[...] == pos_batch_ref[...],
                     0.0, -1e30).astype(jnp.float32)                    # (BM, BS)

    w2 = w2_ref[...]                                                    # (D, D)

    # --- per-head attention; heads fold straight into the w2 contraction ----
    h2 = jnp.zeros((BM, D), jnp.float32) + b2_ref[...]            # start from bias
    for h in range(heads):                                        # static unroll (H=4)
        qh = q[:, h * dh:(h + 1) * dh]                            # (BM, dh)
        kh = kv[:, h * dh:(h + 1) * dh]                           # (BS, dh)
        vh = kv[:, D + h * dh:D + (h + 1) * dh]                   # (BS, dh)

        # raw (unscaled) attention logits; bias keeps batches apart
        s = jax.lax.dot_general(qh, kh, (((1,), (1,)), ((), ())),
                                preferred_element_type=jnp.float32)     # (BM, BS)
        s = s + bias
        s = s - jnp.max(s, axis=-1, keepdims=True)
        p = jnp.exp(s)
        p = p / jnp.sum(p, axis=-1, keepdims=True)
        oh = jnp.dot(p, vh, preferred_element_type=jnp.float32)         # (BM, dh)

        h2 = h2 + jnp.dot(jnp.tanh(oh), w2[h * dh:(h + 1) * dh, :],
                          preferred_element_type=jnp.float32)           # (BM, D)

    # --- scores against the (padded) candidate table, log-softmax ------------
    scores = jnp.dot(h2, candT_ref[...],
                     preferred_element_type=jnp.float32)                # (BM, GCP)
    c_iota = jax.lax.broadcasted_iota(jnp.int32, (BM, GCP), 1)
    scores = jnp.where(c_iota < num_candidates, scores, -1e30)          # mask padding
    m = jnp.max(scores, axis=-1, keepdims=True)
    lse = m + jnp.log(jnp.sum(jnp.exp(scores - m), axis=-1, keepdims=True))
    out_ref[...] = scores - lse


# ----------------------------------------------------------------------------
# Host-side glue (all tiny, fused by jit around the single pallas_call)
# ----------------------------------------------------------------------------
def positional_embedding(seq_len, d_model):
    """Same values as PositionalEmbedding.pe[:, :seq_len, :]."""
    pos = jnp.arange(seq_len, dtype=jnp.float32)[:, None]
    div = jnp.exp(jnp.arange(0, d_model, 2, dtype=jnp.float32)
                  * (-math.log(10000.0) / d_model))
    pe = jnp.zeros((seq_len, d_model), dtype=jnp.float32)
    pe = pe.at[:, 0::2].set(jnp.sin(pos * div))
    pe = pe.at[:, 1::2].set(jnp.cos(pos * div))
    return pe


def attnmove_forward(params, hist_traj_grid, userId, mask_pos,
                     mask_curr_traj_grid, aggregator_hist_traj_grid, *, heads):
    # The hist self-attention, cross attention and liner_transform branch of the
    # reference forward never reach the returned score (the hybrid embedding is
    # immediately overwritten) -> eliminated.
    del hist_traj_grid, userId, aggregator_hist_traj_grid

    emb = params["grid_embedding"]                       # (G, D)
    G, D = emb.shape
    B, S = mask_curr_traj_grid.shape
    M = mask_pos.shape[1]
    GC = G - 2                                           # candidates = emb[2:]
    GCP = ((GC + 127) // 128) * 128                      # lane-dense padded width
    BM = B * M
    BMP = ((BM + 7) // 8) * 8                            # sublane-aligned row count

    # Live self-attention (curr): Q separate, fused K|V.
    wq, bq, wk, bk, wv, bv = params["sa_curr"]
    wkv = jnp.concatenate([wk, wv], axis=1)              # (D, 2D)
    bkv = jnp.concatenate([bk, bv], axis=1)              # (1, 2D)

    pe_flat = jnp.tile(positional_embedding(S, D), (B, 1))        # (B*S, D)

    ids = mask_curr_traj_grid.astype(jnp.int32).reshape(B * S, 1)

    pos_flat = (mask_pos.astype(jnp.int32)
                + jnp.arange(B, dtype=jnp.int32)[:, None] * S).reshape(BM)
    pos_batch = jnp.broadcast_to(jnp.arange(B, dtype=jnp.int32)[:, None],
                                 (B, M)).reshape(BM)
    pad = BMP - BM
    pos_flat = jnp.pad(pos_flat, (0, pad)).reshape(BMP, 1)        # padded rows -> row 0
    pos_batch = jnp.pad(pos_batch, (0, pad)).reshape(BMP, 1)      # padded rows -> batch 0

    col_batch = (jnp.arange(B * S, dtype=jnp.int32) // S).reshape(1, B * S)

    # Candidate table emb[2:].T, zero-padded to GCP lanes (plain MXU matmul in-kernel).
    candT = jnp.zeros((D, GCP), jnp.float32).at[:, :GC].set(emb[2:].T)

    kernel = functools.partial(_attnmove_fused_kernel, heads=heads, num_candidates=GC)
    out = pl.pallas_call(
        kernel,
        out_shape=jax.ShapeDtypeStruct((BMP, GCP), jnp.float32),
        compiler_params=pltpu.CompilerParams(vmem_limit_bytes=32 * 1024 * 1024),
    )(ids, pos_flat, pos_batch, col_batch, emb, pe_flat,
      wq, bq, wkv, bkv, params["w2"], params["b2"], candT)

    return out[:BM, :GC]                                 # drop sublane/lane padding


# ----------------------------------------------------------------------------
# Deterministic parameter init (synthetic, mirrors the torch module's params)
# ----------------------------------------------------------------------------
def init_linear(key, fan_in, fan_out):
    k1, k2 = jax.random.split(key)
    bound = 1.0 / math.sqrt(fan_in)
    w = jax.random.uniform(k1, (fan_in, fan_out), jnp.float32, -bound, bound)
    b = jax.random.uniform(k2, (1, fan_out), jnp.float32, -bound, bound)
    return w, b


def init_attention(key, d_model):
    kq, kk, kv = jax.random.split(key, 3)
    wq, bq = init_linear(kq, d_model, d_model)
    wk, bk = init_linear(kk, d_model, d_model)
    wv, bv = init_linear(kv, d_model, d_model)
    return (wq, bq, wk, bk, wv, bv)


def init_params(key, d_model, grid_count):
    keys = jax.random.split(key, 7)
    params = {}
    params["grid_embedding"] = jax.random.normal(
        keys[0], (grid_count, d_model), jnp.float32)
    params["sa_hist"] = init_attention(keys[1], d_model)     # dead in forward
    params["sa_curr"] = init_attention(keys[2], d_model)     # live
    params["cross"] = init_attention(keys[3], d_model)       # dead in forward
    params["w_hist"], params["b_hist"] = init_linear(keys[4], d_model, d_model)   # unused
    params["w_t"], params["b_t"] = init_linear(keys[5], 2 * d_model, d_model)     # dead
    params["w2"], params["b2"] = init_linear(keys[6], d_model, d_model)           # live
    return params


# ----------------------------------------------------------------------------
# float64 numpy reference of the live reference-model path (sanity check)
# ----------------------------------------------------------------------------
def reference_forward_np(params, mask_pos, mask_curr_traj_grid, heads):
    emb = np.asarray(params["grid_embedding"], np.float64)
    wq, bq, wk, bk, wv, bv = [np.asarray(a, np.float64) for a in params["sa_curr"]]
    w2 = np.asarray(params["w2"], np.float64)
    b2 = np.asarray(params["b2"], np.float64)
    ids = np.asarray(mask_curr_traj_grid)
    pos = np.asarray(mask_pos)
    B, S = ids.shape
    D = emb.shape[1]
    dh = D // heads

    pe = np.zeros((S, D), np.float64)
    position = np.arange(S, dtype=np.float64)[:, None]
    div = np.exp(np.arange(0, D, 2, dtype=np.float64) * (-math.log(10000.0) / D))
    pe[:, 0::2] = np.sin(position * div)
    pe[:, 1::2] = np.cos(position * div)

    x = emb[ids] + pe[None]
    q = x @ wq + bq
    k = x @ wk + bk
    v = x @ wv + bv
    out = np.zeros((B, S, D), np.float64)
    for b in range(B):
        for h in range(heads):
            qh = q[b, :, h * dh:(h + 1) * dh]
            kh = k[b, :, h * dh:(h + 1) * dh]
            vh = v[b, :, h * dh:(h + 1) * dh]
            s = qh @ kh.T
            s = s - s.max(-1, keepdims=True)
            p = np.exp(s)
            p = p / p.sum(-1, keepdims=True)
            out[b, :, h * dh:(h + 1) * dh] = p @ vh
    h2 = np.tanh(out) @ w2 + b2
    idx = (pos + np.arange(B)[:, None] * S).reshape(-1)
    rows = h2.reshape(-1, D)[idx]
    scores = rows @ emb[2:].T
    scores = scores - scores.max(-1, keepdims=True)
    return scores - np.log(np.exp(scores).sum(-1, keepdims=True))


# ----------------------------------------------------------------------------
if __name__ == "__main__":
    d_model, heads, grid_count, user_count = 32, 4, 64, 8
    B, S, n_mask = 2, 8, 3

    root = jax.random.PRNGKey(0)
    k_params, k_mask, k_curr, k_hist = jax.random.split(root, 4)
    params = init_params(k_params, d_model, grid_count)

    hist_traj_grid = jnp.zeros((B, S), jnp.int32)                       # unused
    userId = jnp.zeros((B,), jnp.int32)                                 # unused
    mask_pos = jax.random.randint(k_mask, (B, n_mask), 0, S, jnp.int32)
    mask_curr_traj_grid = jax.random.randint(k_curr, (B, S), 0, grid_count, jnp.int32)
    aggregator_hist_traj_grid = jax.random.randint(k_hist, (B, S), 0, grid_count, jnp.int32)

    fwd = jax.jit(attnmove_forward, static_argnames=("heads",))
    score = fwd(params, hist_traj_grid, userId, mask_pos,
                mask_curr_traj_grid, aggregator_hist_traj_grid, heads=heads)
    score = jax.block_until_ready(score)

    assert score.shape == (B * n_mask, grid_count - 2), score.shape
    assert score.dtype == jnp.float32
    assert bool(jnp.all(jnp.isfinite(score)))
    probs = jnp.exp(score)
    # log_softmax rows must sum to ~1
    assert bool(jnp.all(jnp.abs(jnp.sum(probs, axis=-1) - 1.0) < 1e-3))

    # loose sanity check against a float64 reference of the live torch path
    # (tolerance is generous to allow TPU default matmul precision)
    ref_probs = np.exp(reference_forward_np(params, mask_pos, mask_curr_traj_grid, heads))
    assert float(np.max(np.abs(ref_probs - np.asarray(probs)))) < 5e-2

    print("KERNEL_OK")
</pallas_src>

<mosaic_0001>
module attributes {stable_mosaic.version = 11 : i64} {
  func.func @_attnmove_fused_kernel(%arg0: memref<16x1xi32, #tpu.memory_space<vmem>>, %arg1: memref<8x1xi32, #tpu.memory_space<vmem>>, %arg2: memref<8x1xi32, #tpu.memory_space<vmem>>, %arg3: memref<1x16xi32, #tpu.memory_space<vmem>>, %arg4: memref<64x32xf32, #tpu.memory_space<vmem>>, %arg5: memref<16x32xf32, #tpu.memory_space<vmem>>, %arg6: memref<32x32xf32, #tpu.memory_space<vmem>>, %arg7: memref<1x32xf32, #tpu.memory_space<vmem>>, %arg8: memref<32x64xf32, #tpu.memory_space<vmem>>, %arg9: memref<1x64xf32, #tpu.memory_space<vmem>>, %arg10: memref<32x32xf32, #tpu.memory_space<vmem>>, %arg11: memref<1x32xf32, #tpu.memory_space<vmem>>, %arg12: memref<32x128xf32, #tpu.memory_space<vmem>>, %arg13: memref<8x128xf32, #tpu.memory_space<vmem>>) attributes {dimension_semantics = [], scalar_prefetch = 0 : i64, scratch_operands = 0 : i64, tpu.core_type = #tpu.core_type<tc>} {
    %c0 = arith.constant 0 : index
    %c0_0 = arith.constant 0 : index
    %0 = vector.load %arg0[%c0, %c0_0] : memref<16x1xi32, #tpu.memory_space<vmem>>, vector<16x1xi32>
    %1 = tpu.iota {dimensions = array<i32: 1>} : vector<16x64xi32>
    %2 = vector.broadcast %0 : vector<16x1xi32> to vector<16x64xi32>
    %3 = arith.cmpi eq, %1, %2 : vector<16x64xi32>
    %cst = arith.constant 1.000000e+00 : f32
    %cst_1 = arith.constant 0.000000e+00 : f32
    %4 = vector.broadcast %cst : f32 to vector<16x64xf32>
    %5 = vector.broadcast %cst_1 : f32 to vector<16x64xf32>
    %6 = arith.select %3, %4, %5 : vector<16x64xi1>, vector<16x64xf32>
    %c0_2 = arith.constant 0 : index
    %c0_3 = arith.constant 0 : index
    %7 = vector.load %arg4[%c0_2, %c0_3] : memref<64x32xf32, #tpu.memory_space<vmem>>, vector<64x32xf32>
    %cst_4 = arith.constant dense<0.000000e+00> : vector<16x32xf32>
    %8 = tpu.matmul %6, %7, %cst_4 {dimension_numbers = #tpu.dot_dimension_numbers<[1], [0], [0], [1], [0, 0, 1, 1], [], []>} : vector<16x64xf32>, vector<64x32xf32>, vector<16x32xf32> -> vector<16x32xf32>
    %c0_5 = arith.constant 0 : index
    %c0_6 = arith.constant 0 : index
    %9 = vector.load %arg5[%c0_5, %c0_6] : memref<16x32xf32, #tpu.memory_space<vmem>>, vector<16x32xf32>
    %10 = arith.addf %8, %9 : vector<16x32xf32>
    %c0_7 = arith.constant 0 : index
    %c0_8 = arith.constant 0 : index
    %11 = vector.load %arg1[%c0_7, %c0_8] : memref<8x1xi32, #tpu.memory_space<vmem>>, vector<8x1xi32>
    %12 = tpu.iota {dimensions = array<i32: 1>} : vector<8x16xi32>
    %13 = vector.broadcast %11 : vector<8x1xi32> to vector<8x16xi32>
    %14 = arith.cmpi eq, %12, %13 : vector<8x16xi32>
    %cst_9 = arith.constant 1.000000e+00 : f32
    %cst_10 = arith.constant 0.000000e+00 : f32
    %15 = vector.broadcast %cst_9 : f32 to vector<8x16xf32>
    %16 = vector.broadcast %cst_10 : f32 to vector<8x16xf32>
    %17 = arith.select %14, %15, %16 : vector<8x16xi1>, vector<8x16xf32>
    %cst_11 = arith.constant dense<0.000000e+00> : vector<8x32xf32>
    %18 = tpu.matmul %17, %10, %cst_11 {dimension_numbers = #tpu.dot_dimension_numbers<[1], [0], [0], [1], [0, 0, 1, 1], [], []>} : vector<8x16xf32>, vector<16x32xf32>, vector<8x32xf32> -> vector<8x32xf32>
    %c0_12 = arith.constant 0 : index
    %c0_13 = arith.constant 0 : index
    %19 = vector.load %arg6[%c0_12, %c0_13] : memref<32x32xf32, #tpu.memory_space<vmem>>, vector<32x32xf32>
    %cst_14 = arith.constant dense<0.000000e+00> : vector<8x32xf32>
    %20 = tpu.matmul %18, %19, %cst_14 {dimension_numbers = #tpu.dot_dimension_numbers<[1], [0], [0], [1], [0, 0, 1, 1], [], []>} : vector<8x32xf32>, vector<32x32xf32>, vector<8x32xf32> -> vector<8x32xf32>
    %c0_15 = arith.constant 0 : index
    %c0_16 = arith.constant 0 : index
    %21 = vector.load %arg7[%c0_15, %c0_16] : memref<1x32xf32, #tpu.memory_space<vmem>>, vector<1x32xf32>
    %22 = vector.broadcast %21 : vector<1x32xf32> to vector<8x32xf32>
    %23 = arith.addf %20, %22 : vector<8x32xf32>
    %c0_17 = arith.constant 0 : index
    %c0_18 = arith.constant 0 : index
    %24 = vector.load %arg8[%c0_17, %c0_18] : memref<32x64xf32, #tpu.memory_space<vmem>>, vector<32x64xf32>
    %cst_19 = arith.constant dense<0.000000e+00> : vector<16x64xf32>
    %25 = tpu.matmul %10, %24, %cst_19 {dimension_numbers = #tpu.dot_dimension_numbers<[1], [0], [0], [1], [0, 0, 1, 1], [], []>} : vector<16x32xf32>, vector<32x64xf32>, vector<16x64xf32> -> vector<16x64xf32>
    %c0_20 = arith.constant 0 : index
    %c0_21 = arith.constant 0 : index
    %26 = vector.load %arg9[%c0_20, %c0_21] : memref<1x64xf32, #tpu.memory_space<vmem>>, vector<1x64xf32>
    %27 = vector.broadcast %26 : vector<1x64xf32> to vector<16x64xf32>
    %28 = arith.addf %25, %27 : vector<16x64xf32>
    %c0_22 = arith.constant 0 : index
    %c0_23 = arith.constant 0 : index
    %29 = vector.load %arg3[%c0_22, %c0_23] : memref<1x16xi32, #tpu.memory_space<vmem>>, vector<1x16xi32>
    %c0_24 = arith.constant 0 : index
    %c0_25 = arith.constant 0 : index
    %30 = vector.load %arg2[%c0_24, %c0_25] : memref<8x1xi32, #tpu.memory_space<vmem>>, vector<8x1xi32>
    %31 = vector.broadcast %29 : vector<1x16xi32> to vector<8x16xi32>
    %32 = vector.broadcast %30 : vector<8x1xi32> to vector<8x16xi32>
    %33 = arith.cmpi eq, %31, %32 : vector<8x16xi32>
    %cst_26 = arith.constant 0.000000e+00 : f32
    %cst_27 = arith.constant -1.000000e+30 : f32
    %34 = vector.broadcast %cst_26 : f32 to vector<8x16xf32>
    %35 = vector.broadcast %cst_27 : f32 to vector<8x16xf32>
    %36 = arith.select %33, %34, %35 : vector<8x16xi1>, vector<8x16xf32>
    %c0_28 = arith.constant 0 : index
    %c0_29 = arith.constant 0 : index
    %37 = vector.load %arg10[%c0_28, %c0_29] : memref<32x32xf32, #tpu.memory_space<vmem>>, vector<32x32xf32>
    %cst_30 = arith.constant 0.000000e+00 : f32
    %38 = vector.broadcast %cst_30 : f32 to vector<8x32xf32>
    %c0_31 = arith.constant 0 : index
    %c0_32 = arith.constant 0 : index
    %39 = vector.load %arg11[%c0_31, %c0_32] : memref<1x32xf32, #tpu.memory_space<vmem>>, vector<1x32xf32>
    %40 = vector.broadcast %39 : vector<1x32xf32> to vector<8x32xf32>
    %41 = arith.addf %38, %40 : vector<8x32xf32>
    %42 = vector.extract_strided_slice %23 {offsets = [0, 0], sizes = [8, 8], strides = [1, 1]} : vector<8x32xf32> to vector<8x8xf32>
    %43 = vector.extract_strided_slice %28 {offsets = [0, 0], sizes = [16, 8], strides = [1, 1]} : vector<16x64xf32> to vector<16x8xf32>
    %44 = vector.extract_strided_slice %28 {offsets = [0, 32], sizes = [16, 8], strides = [1, 1]} : vector<16x64xf32> to vector<16x8xf32>
    %cst_33 = arith.constant dense<0.000000e+00> : vector<8x16xf32>
    %45 = tpu.matmul %42, %43, %cst_33 {dimension_numbers = #tpu.dot_dimension_numbers<[1], [1], [0], [0], [0, 0, 1, 0], [], []>} : vector<8x8xf32>, vector<16x8xf32>, vector<8x16xf32> -> vector<8x16xf32>
    %46 = arith.addf %45, %36 : vector<8x16xf32>
    %cst_34 = arith.constant dense<0xFF800000> : vector<8xf32>
    %47 = vector.multi_reduction <maximumf>, %46, %cst_34 [1] : vector<8x16xf32> to vector<8xf32>
    %48 = vector.shape_cast %47 : vector<8xf32> to vector<8x1xf32>
    %49 = vector.broadcast %48 : vector<8x1xf32> to vector<8x16xf32>
    %50 = arith.subf %46, %49 : vector<8x16xf32>
    %51 = math.exp %50 : vector<8x16xf32>
    %cst_35 = arith.constant dense<0.000000e+00> : vector<8xf32>
    %52 = vector.multi_reduction <add>, %51, %cst_35 [1] : vector<8x16xf32> to vector<8xf32>
    %53 = vector.shape_cast %52 : vector<8xf32> to vector<8x1xf32>
    %54 = vector.broadcast %53 : vector<8x1xf32> to vector<8x16xf32>
    %55 = arith.divf %51, %54 : vector<8x16xf32>
    %cst_36 = arith.constant dense<0.000000e+00> : vector<8x8xf32>
    %56 = tpu.matmul %55, %44, %cst_36 {dimension_numbers = #tpu.dot_dimension_numbers<[1], [0], [0], [1], [0, 0, 1, 1], [], []>} : vector<8x16xf32>, vector<16x8xf32>, vector<8x8xf32> -> vector<8x8xf32>
    %57 = math.tanh %56 : vector<8x8xf32>
    %58 = vector.extract_strided_slice %37 {offsets = [0, 0], sizes = [8, 32], strides = [1, 1]} : vector<32x32xf32> to vector<8x32xf32>
    %cst_37 = arith.constant dense<0.000000e+00> : vector<8x32xf32>
    %59 = tpu.matmul %57, %58, %cst_37 {dimension_numbers = #tpu.dot_dimension_numbers<[1], [0], [0], [1], [0, 0, 1, 1], [], []>} : vector<8x8xf32>, vector<8x32xf32>, vector<8x32xf32> -> vector<8x32xf32>
    %60 = arith.addf %41, %59 : vector<8x32xf32>
    %61 = vector.extract_strided_slice %23 {offsets = [0, 8], sizes = [8, 8], strides = [1, 1]} : vector<8x32xf32> to vector<8x8xf32>
    %62 = vector.extract_strided_slice %28 {offsets = [0, 8], sizes = [16, 8], strides = [1, 1]} : vector<16x64xf32> to vector<16x8xf32>
    %63 = vector.extract_strided_slice %28 {offsets = [0, 40], sizes = [16, 8], strides = [1, 1]} : vector<16x64xf32> to vector<16x8xf32>
    %cst_38 = arith.constant dense<0.000000e+00> : vector<8x16xf32>
    %64 = tpu.matmul %61, %62, %cst_38 {dimension_numbers = #tpu.dot_dimension_numbers<[1], [1], [0], [0], [0, 0, 1, 0], [], []>} : vector<8x8xf32>, vector<16x8xf32>, vector<8x16xf32> -> vector<8x16xf32>
    %65 = arith.addf %64, %36 : vector<8x16xf32>
    %cst_39 = arith.constant dense<0xFF800000> : vector<8xf32>
    %66 = vector.multi_reduction <maximumf>, %65, %cst_39 [1] : vector<8x16xf32> to vector<8xf32>
    %67 = vector.shape_cast %66 : vector<8xf32> to vector<8x1xf32>
    %68 = vector.broadcast %67 : vector<8x1xf32> to vector<8x16xf32>
    %69 = arith.subf %65, %68 : vector<8x16xf32>
    %70 = math.exp %69 : vector<8x16xf32>
    %cst_40 = arith.constant dense<0.000000e+00> : vector<8xf32>
    %71 = vector.multi_reduction <add>, %70, %cst_40 [1] : vector<8x16xf32> to vector<8xf32>
    %72 = vector.shape_cast %71 : vector<8xf32> to vector<8x1xf32>
    %73 = vector.broadcast %72 : vector<8x1xf32> to vector<8x16xf32>
    %74 = arith.divf %70, %73 : vector<8x16xf32>
    %cst_41 = arith.constant dense<0.000000e+00> : vector<8x8xf32>
    %75 = tpu.matmul %74, %63, %cst_41 {dimension_numbers = #tpu.dot_dimension_numbers<[1], [0], [0], [1], [0, 0, 1, 1], [], []>} : vector<8x16xf32>, vector<16x8xf32>, vector<8x8xf32> -> vector<8x8xf32>
    %76 = math.tanh %75 : vector<8x8xf32>
    %77 = vector.extract_strided_slice %37 {offsets = [8, 0], sizes = [8, 32], strides = [1, 1]} : vector<32x32xf32> to vector<8x32xf32>
    %cst_42 = arith.constant dense<0.000000e+00> : vector<8x32xf32>
    %78 = tpu.matmul %76, %77, %cst_42 {dimension_numbers = #tpu.dot_dimension_numbers<[1], [0], [0], [1], [0, 0, 1, 1], [], []>} : vector<8x8xf32>, vector<8x32xf32>, vector<8x32xf32> -> vector<8x32xf32>
    %79 = arith.addf %60, %78 : vector<8x32xf32>
    %80 = vector.extract_strided_slice %23 {offsets = [0, 16], sizes = [8, 8], strides = [1, 1]} : vector<8x32xf32> to vector<8x8xf32>
    %81 = vector.extract_strided_slice %28 {offsets = [0, 16], sizes = [16, 8], strides = [1, 1]} : vector<16x64xf32> to vector<16x8xf32>
    %82 = vector.extract_strided_slice %28 {offsets = [0, 48], sizes = [16, 8], strides = [1, 1]} : vector<16x64xf32> to vector<16x8xf32>
    %cst_43 = arith.constant dense<0.000000e+00> : vector<8x16xf32>
    %83 = tpu.matmul %80, %81, %cst_43 {dimension_numbers = #tpu.dot_dimension_numbers<[1], [1], [0], [0], [0, 0, 1, 0], [], []>} : vector<8x8xf32>, vector<16x8xf32>, vector<8x16xf32> -> vector<8x16xf32>
    %84 = arith.addf %83, %36 : vector<8x16xf32>
    %cst_44 = arith.constant dense<0xFF800000> : vector<8xf32>
    %85 = vector.multi_reduction <maximumf>, %84, %cst_44 [1] : vector<8x16xf32> to vector<8xf32>
    %86 = vector.shape_cast %85 : vector<8xf32> to vector<8x1xf32>
    %87 = vector.broadcast %86 : vector<8x1xf32> to vector<8x16xf32>
    %88 = arith.subf %84, %87 : vector<8x16xf32>
    %89 = math.exp %88 : vector<8x16xf32>
    %cst_45 = arith.constant dense<0.000000e+00> : vector<8xf32>
    %90 = vector.multi_reduction <add>, %89, %cst_45 [1] : vector<8x16xf32> to vector<8xf32>
    %91 = vector.shape_cast %90 : vector<8xf32> to vector<8x1xf32>
    %92 = vector.broadcast %91 : vector<8x1xf32> to vector<8x16xf32>
    %93 = arith.divf %89, %92 : vector<8x16xf32>
    %cst_46 = arith.constant dense<0.000000e+00> : vector<8x8xf32>
    %94 = tpu.matmul %93, %82, %cst_46 {dimension_numbers = #tpu.dot_dimension_numbers<[1], [0], [0], [1], [0, 0, 1, 1], [], []>} : vector<8x16xf32>, vector<16x8xf32>, vector<8x8xf32> -> vector<8x8xf32>
    %95 = math.tanh %94 : vector<8x8xf32>
    %96 = vector.extract_strided_slice %37 {offsets = [16, 0], sizes = [8, 32], strides = [1, 1]} : vector<32x32xf32> to vector<8x32xf32>
    %cst_47 = arith.constant dense<0.000000e+00> : vector<8x32xf32>
    %97 = tpu.matmul %95, %96, %cst_47 {dimension_numbers = #tpu.dot_dimension_numbers<[1], [0], [0], [1], [0, 0, 1, 1], [], []>} : vector<8x8xf32>, vector<8x32xf32>, vector<8x32xf32> -> vector<8x32xf32>
    %98 = arith.addf %79, %97 : vector<8x32xf32>
    %99 = vector.extract_strided_slice %23 {offsets = [0, 24], sizes = [8, 8], strides = [1, 1]} : vector<8x32xf32> to vector<8x8xf32>
    %100 = vector.extract_strided_slice %28 {offsets = [0, 24], sizes = [16, 8], strides = [1, 1]} : vector<16x64xf32> to vector<16x8xf32>
    %101 = vector.extract_strided_slice %28 {offsets = [0, 56], sizes = [16, 8], strides = [1, 1]} : vector<16x64xf32> to vector<16x8xf32>
    %cst_48 = arith.constant dense<0.000000e+00> : vector<8x16xf32>
    %102 = tpu.matmul %99, %100, %cst_48 {dimension_numbers = #tpu.dot_dimension_numbers<[1], [1], [0], [0], [0, 0, 1, 0], [], []>} : vector<8x8xf32>, vector<16x8xf32>, vector<8x16xf32> -> vector<8x16xf32>
    %103 = arith.addf %102, %36 : vector<8x16xf32>
    %cst_49 = arith.constant dense<0xFF800000> : vector<8xf32>
    %104 = vector.multi_reduction <maximumf>, %103, %cst_49 [1] : vector<8x16xf32> to vector<8xf32>
    %105 = vector.shape_cast %104 : vector<8xf32> to vector<8x1xf32>
    %106 = vector.broadcast %105 : vector<8x1xf32> to vector<8x16xf32>
    %107 = arith.subf %103, %106 : vector<8x16xf32>
    %108 = math.exp %107 : vector<8x16xf32>
    %cst_50 = arith.constant dense<0.000000e+00> : vector<8xf32>
    %109 = vector.multi_reduction <add>, %108, %cst_50 [1] : vector<8x16xf32> to vector<8xf32>
    %110 = vector.shape_cast %109 : vector<8xf32> to vector<8x1xf32>
    %111 = vector.broadcast %110 : vector<8x1xf32> to vector<8x16xf32>
    %112 = arith.divf %108, %111 : vector<8x16xf32>
    %cst_51 = arith.constant dense<0.000000e+00> : vector<8x8xf32>
    %113 = tpu.matmul %112, %101, %cst_51 {dimension_numbers = #tpu.dot_dimension_numbers<[1], [0], [0], [1], [0, 0, 1, 1], [], []>} : vector<8x16xf32>, vector<16x8xf32>, vector<8x8xf32> -> vector<8x8xf32>
    %114 = math.tanh %113 : vector<8x8xf32>
    %115 = vector.extract_strided_slice %37 {offsets = [24, 0], sizes = [8, 32], strides = [1, 1]} : vector<32x32xf32> to vector<8x32xf32>
    %cst_52 = arith.constant dense<0.000000e+00> : vector<8x32xf32>
    %116 = tpu.matmul %114, %115, %cst_52 {dimension_numbers = #tpu.dot_dimension_numbers<[1], [0], [0], [1], [0, 0, 1, 1], [], []>} : vector<8x8xf32>, vector<8x32xf32>, vector<8x32xf32> -> vector<8x32xf32>
    %117 = arith.addf %98, %116 : vector<8x32xf32>
    %c0_53 = arith.constant 0 : index
    %c0_54 = arith.constant 0 : index
    %118 = vector.load %arg12[%c0_53, %c0_54] : memref<32x128xf32, #tpu.memory_space<vmem>>, vector<32x128xf32>
    %cst_55 = arith.constant dense<0.000000e+00> : vector<8x128xf32>
    %119 = tpu.matmul %117, %118, %cst_55 {dimension_numbers = #tpu.dot_dimension_numbers<[1], [0], [0], [1], [0, 0, 1, 1], [], []>} : vector<8x32xf32>, vector<32x128xf32>, vector<8x128xf32> -> vector<8x128xf32>
    %120 = tpu.iota {dimensions = array<i32: 1>} : vector<8x128xi32>
    %c62_i32 = arith.constant 62 : i32
    %121 = vector.broadcast %c62_i32 : i32 to vector<8x128xi32>
    %122 = arith.cmpi slt, %120, %121 : vector<8x128xi32>
    %cst_56 = arith.constant -1.000000e+30 : f32
    %123 = vector.broadcast %cst_56 : f32 to vector<8x128xf32>
    %124 = arith.select %122, %119, %123 : vector<8x128xi1>, vector<8x128xf32>
    %cst_57 = arith.constant dense<0xFF800000> : vector<8xf32>
    %125 = vector.multi_reduction <maximumf>, %124, %cst_57 [1] : vector<8x128xf32> to vector<8xf32>
    %126 = vector.shape_cast %125 : vector<8xf32> to vector<8x1xf32>
    %127 = vector.broadcast %126 : vector<8x1xf32> to vector<8x128xf32>
    %128 = arith.subf %124, %127 : vector<8x128xf32>
    %129 = math.exp %128 : vector<8x128xf32>
    %cst_58 = arith.constant dense<0.000000e+00> : vector<8xf32>
    %130 = vector.multi_reduction <add>, %129, %cst_58 [1] : vector<8x128xf32> to vector<8xf32>
    %131 = vector.shape_cast %130 : vector<8xf32> to vector<8x1xf32>
    %132 = math.log %131 : vector<8x1xf32>
    %133 = arith.addf %126, %132 : vector<8x1xf32>
    %134 = vector.broadcast %133 : vector<8x1xf32> to vector<8x128xf32>
    %135 = arith.subf %124, %134 : vector<8x128xf32>
    %c0_59 = arith.constant 0 : index
    %c0_60 = arith.constant 0 : index
    %136 = vector.load %arg13[%c0_59, %c0_60] : memref<8x128xf32, #tpu.memory_space<vmem>>, vector<8x128xf32>
    tpu.vector_store %arg13[%c0_59, %c0_60], %135 {strides = array<i32>} : memref<8x128xf32, #tpu.memory_space<vmem>>, vector<8x128xf32>,
    return
  }
}

</mosaic_0001>

<bundles_post_ra>
// kernel: attnmove_forward.1
= control target key start
LH: loop header
LB: loop body
LE: loop exit
PB: predicated region body
PF: predicated region fallthrough
CT: control target
= control target key end

     0   :  { %v1925_v2 = vmov 0   ;;  %s2238_s0 = inlined_call_operand.vmem [shape: s32[16,1], index: 0, kind: input, shape index: {}]   ;;  %s2239_s1 = inlined_call_operand.vmem [shape: s32[8,1], index: 1, kind: input, shape index: {}]   ;;  %s2240_s2 = inlined_call_operand.vmem [shape: s32[8,1], index: 2, kind: input, shape index: {}]   ;;  %s2241_s3 = inlined_call_operand.vmem [shape: s32[1,16], index: 3, kind: input, shape index: {}]   ;;  %s2242_s4 = inlined_call_operand.vmem [shape: f32[64,32], index: 4, kind: input, shape index: {}]   ;;  %s2243_s5 = inlined_call_operand.vmem [shape: f32[16,32], index: 5, kind: input, shape index: {}]   ;;  %s2244_s6 = inlined_call_operand.vmem [shape: f32[32,32], index: 6, kind: input, shape index: {}]   ;;  %s2245_s7 = inlined_call_operand.vmem [shape: f32[1,32], index: 7, kind: input, shape index: {}]   ;;  %s2246_s8 = inlined_call_operand.vmem [shape: f32[32,64], index: 8, kind: input, shape index: {}]   ;;  %s2247_s9 = inlined_call_operand.vmem [shape: f32[1,64], index: 9, kind: input, shape index: {}]   ;;  %s2248_s10 = inlined_call_operand.vmem [shape: f32[32,32], index: 10, kind: input, shape index: {}]   ;;  %s2249_s11 = inlined_call_operand.vmem [shape: f32[1,32], index: 11, kind: input, shape index: {}]   ;;  %s2250_s12 = inlined_call_operand.vmem [shape: f32[32,128], index: 12, kind: input, shape index: {}]   ;;  %s2251_s13 = inlined_call_operand.hbm [shape: f32[8,128], index: 13, kind: output, shape index: {}]  }
   0x1   :  { %v45_v0 = vld [vmem:[%s2238_s0] sm:$0xff]  ;;  %1836 = vset.pattern.permute.xlu0 %v1925_v2  ;;  %v60_v3 = vld [vmem:[%s2242_s4 + $0x8] sm:$0xff]  ;;  %v61_v4 = vld [vmem:[%s2242_s4 + $0x10] sm:$0xff]  ;;  %1837 = vset.pattern.permute.xlu1 %v1925_v2 }
   0x2   :  { %v59_v1 = vld [vmem:[%s2242_s4] sm:$0xff]  ;;  %v62_v5 = vld [vmem:[%s2242_s4 + $0x18] sm:$0xff]  ;;  %50 = vperm.xlu0 %1836, %v45_v0   ;;  %v46_v6 = vld [vmem:[%s2238_s0 + $0x8] sm:$0xff] }
   0x3   :  { %v1749_v7 = vpack.c.bf16 %v60_v3, %v59_v1  ;;  %v1753_v8 = vpack.c.bf16 %v62_v5, %v61_v4  ;;  %v63_v9 = vld [vmem:[%s2242_s4 + $0x20] sm:$0xff]  ;;  %v64_v10 = vld [vmem:[%s2242_s4 + $0x28] sm:$0xff] }
   0x4   :  { %18 = vsyncpa [#allocation3], 0  ;;  %v1757_v11 = vpack.c.bf16 %v64_v10, %v63_v9  ;;  %v65_v12 = vld [vmem:[%s2242_s4 + $0x30] sm:$0xff]  ;;  %v66_v13 = vld [vmem:[%s2242_s4 + $0x38] sm:$0xff]  ;;  %v47_v17 = vlaneseq  ;;  %vm69_vm0 = vcmask 523264   ;;  %v1926_v20 = vmov 0.0  }
   0x5   :  { %1750 = vmatprep.subr.bf16.mxu0 %v1749_v7  ;;  %v151_v14 = vld [vmem:[%s2239_s1] sm:$0xff]  ;;  %v1761_v15 = vpack.c.bf16 %v66_v13, %v65_v12  ;;  %v1927_v24 = vmov 0.0|0.0   ;;  %vm1928_vm3 = vmmov 0   ;;  %v68_v25 = vld [vmem:[%s2243_s5 + $0x8] sm:$0xff]  ;;  %vm157_vm5 = vcmask 130048   ;;  %v233_v37 = vld [vmem:[%s2244_s6 + $0x10] sm:$0xff] }
   0x6   :  { %1752 = vmatpush3.bf16.msra.mxu0 %v1749_v7  ;;  %53 = vperm.xlu0 %1836, %v46_v6   ;;  %v409_v16 = vld [vmem:[%s2240_s2] sm:$0xff]  ;;  %v2044_v18 = vand.u32 127, %v47_v17  ;;  %v232_v33 = vld [vmem:[%s2244_s6 + $0x8] sm:$0xff]  ;;  %v234_v38 = vld [vmem:[%s2244_s6 + $0x18] sm:$0xff]  ;;  %vm242_vm6 = vcmask 261120   ;;  %vm431_vm7 = vcmask 64512  }
   0x7   :  { %1754 = vmatprep.subr.bf16.mxu0 %v1753_v8  ;;  %153 = vperm.xlu1 %1837, %v151_v14   ;;  %v67_v26 = vld [vmem:[%s2243_s5] sm:$0xff]  ;;  %v1772_v39 = vpack.c.bf16 %v234_v38, %v233_v37  ;;  %v317_v41 = vld [vmem:[%s2246_s8 + $0x8] sm:$0xff]  ;;  %v318_v43 = vld [vmem:[%s2246_s8 + $0x10] sm:$0xff]  ;;  %v1929_v62 = vmov -1e+30   ;;  %s1931_s2 = smov 120  }
   0x8   :  { %1765 = vmatprep.subr.bf16.mxu1 %v1927_v24  ;;  %1637 = vmatprep.mubr.msk.f32.mxu1 %vm1928_vm3, %v1926_v20  ;;  %v231_v32 = vld [vmem:[%s2244_s6] sm:$0xff]  ;;  %v319_v44 = vld [vmem:[%s2246_s8 + $0x18] sm:$0xff]  ;;  %vm2104_vm8 = vmpackc.low %vm431_vm7, %vm431_vm7  ;;  %s1932_s4 = smov 112   ;;  %s1933_s15 = smov 104   ;;  %vm1494_vm10 = vcmp.lt.s32.totalorder %v2044_v18, 62 }
   0x9   :  { %v1769_v36 = vpack.c.bf16 %v232_v33, %v231_v32  ;;  %v316_v40 = vld [vmem:[%s2246_s8] sm:$0xff]  ;;  %v1778_v45 = vpack.c.bf16 %v319_v44, %v318_v43  ;;  %s1934_s16 = smov 88   ;;  %s1935_s17 = smov 80  }
   0xa   :  { %1756 = vmatpush3.bf16.msra.mxu0 %v1753_v8  ;;  %v1774_v42 = vpack.c.bf16 %v317_v41, %v316_v40  ;;  %v1527_v50 = vld [vmem:[%s2247_s9] ss:$0 sm:$0xff]  ;;  %s1936_s19 = smov 72  }
   0xb   :  { %1758 = vmatprep.subr.bf16.mxu0 %v1757_v11  ;;  %415 = vperm.xlu1 %1837, %v409_v16   ;;  %v1525_v58 = vld [vmem:[%s2245_s7] ss:$0 sm:$0xff]  ;;  %s1930_s7 = smov 96  }
   0xc   :  { %v1530_v60 = vld [vmem:[%s2241_s3] ss:$0 sm:$0xff] }
   0xe   :  { %1760 = vmatpush3.bf16.msra.mxu0 %v1757_v11 }
   0xf   :  { %1762 = vmatprep.subr.bf16.mxu0 %v1761_v15 }
  0x12   :  { %1764 = vmatpush3.bf16.msra.mxu0 %v1761_v15 }
  0x13   :  { %1782 = vmatprep.subr.bf16.mxu0 %v1927_v24 }
  0x81   :  { %v51_v19 = vpop.permute.xlu0 %50 }
  0x82   :  { %vm55_vm1 = vcmp.eq.s32.totalorder %v2044_v18, %v51_v19 }
  0x83   :  { %v57_v21 = vsel %vm55_vm1, 1.0, %v1926_v20 }
  0x84   :  { %1630 = vmatprep.mubr.msk.f32.mxu0 %vm69_vm0, %v57_v21 }
  0x85   :  { %v54_v22 = vpop.permute.xlu0 %53 }
  0x86   :  { %vm56_vm2 = vcmp.eq.s32.totalorder %v2044_v18, %v54_v22  ;;  %v154_v31 = vpop.permute.xlu1 %153 }
  0x87   :  { %v58_v23 = vsel %vm56_vm2, 1.0, %v1926_v20  ;;  %vm155_vm4 = vcmp.eq.s32.totalorder %v2044_v18, %v154_v31 }
  0x88   :  { %1631 = vmatmul.mubr.msk.f32.vlgmr.msra.gmra.mrb[0].mxu0 %vm69_vm0, %v58_v23  ;;  %v156_v35 = vsel %vm155_vm4, 1.0, %v1926_v20 }
  0x89   :  { %1666 = vmatprep.mubr.msk.f32.mxu0 %vm1928_vm3, %v1926_v20 }
  0x8a   :  { %v416_v61 = vpop.permute.xlu1 %415 }
  0x8b   :  { %vm417_vm9 = vcmp.eq.s32.totalorder %v1530_v60, %v416_v61 }
  0x8c   :  { %v2125_v63 = vsel %vm417_vm9, 0.0, %v1929_v62 }
 0x15b   :  { %v1632_v27 = vpop.f32.mrb[0].mxu0 }
 0x15c   :  { %v148_v28 = vadd.f32 %v1632_v27, %v68_v25  ;;  %v142_v29 = vpop.f32.mrb[1].mxu0 }
 0x15d   :  { %v143_v30 = vadd.f32 %v142_v29, %v67_v26  ;;  %v419_v29 = vld [vmem:[%s2248_s10] sm:$0xff] }
 0x15f   :  { %v1766_v34 = vpack.c.bf16 %v148_v28, %v143_v30 }
 0x161   :  { %1767 = vmatpush3.bf16.msra.mxu1 %v1766_v34 }
 0x162   :  { %1768 = vmatprep.subr.bf16.mxu1 %v1927_v24 }
 0x164   :  { %1638 = vmatmul.mubr.msk.f32.vlgmr.msra.gmra.mrb[0].mxu1 %vm157_vm5, %v156_v35 }
 0x165   :  { %1770 = vmatpush3.bf16.msra.mxu1 %v1769_v36  ;;  %1648 = vmatprep.mubr.msk.f32.mxu1 %vm1928_vm3, %v1926_v20 }
 0x166   :  { %1771 = vmatprep.subr.bf16.mxu1 %v1927_v24 }
 0x169   :  { %1773 = vmatpush3.bf16.msra.mxu1 %v1772_v39 }
 0x16a   :  { %1775 = vmatprep.subr.bf16.mxu1 %v1774_v42 }
 0x237   :  { %v227_v46 = vpop.f32.mrb[0].mxu1 }
 0x238   :  { %v1639_v47 = vpop.f32.mrb[1].mxu1  ;;  %1649 = vmatmul.mubr.msk.f32.vlgmr.msra.gmra.mrb[2].mxu1 %vm242_vm6, %v227_v46 }
 0x239   :  { %1777 = vmatpush3.bf16.msra.mxu1 %v1774_v42  ;;  %1659 = vmatprep.mubr.msk.f32.mxu1 %vm242_vm6, %v143_v30 }
 0x23a   :  { %1779 = vmatprep.subr.bf16.mxu1 %v1778_v45 }
 0x23d   :  { %1781 = vmatpush3.bf16.msra.mxu1 %v1778_v45 }
 0x23e   :  { %1786 = vmatprep.subr.bf16.mxu1 %v1927_v24 }
 0x240   :  { %1660 = vmatmul.mubr.msk.f32.vlgmr.msra.gmra.mrb[4].mxu1 %vm242_vm6, %v148_v28 }
 0x241   :  { %1673 = vmatprep.mubr.msk.f32.mxu1 %vm1928_vm3, %v1926_v20 }
 0x30b   :  { %v312_v48 = vpop.f32.mrb[2].mxu1 }
 0x30c   :  { %v1650_v49 = vpop.f32.mrb[3].mxu1  ;;  %v2116_v59 = vadd.f32 %v1525_v58, %v312_v48 }
 0x313   :  { %v1661_v51 = vpop.f32.mrb[4].mxu1 }
 0x314   :  { %v405_v52 = vadd.f32 %v1661_v51, %v1527_v50  ;;  %v399_v53 = vpop.f32.mrb[5].mxu1 }
 0x315   :  { %v400_v54 = vadd.f32 %v1527_v50, %v399_v53 }
 0x317   :  { %v1783_v56 = vpack.c.bf16 %v405_v52, %v400_v54  ;;  %v2108_v57 = vpack.i.bf16 %v405_v52, %v400_v54 }
 0x319   :  { %1785 = vmatpush3.bf16.xpose.msk.msra.mxu0 %vm2104_vm8, %v1783_v56 }
 0x31a   :  { %1676 = vmatprep.subr.mxu0 %v1926_v20 }
 0x320   :  { %1667 = vmatmul.mubr.msk.f32.vlgmr.msra.gmra.mrb[2].mxu0 %vm431_vm7, %v2116_v59 }
 0x321   :  { %1678 = vmatprep.mubr.msk.f32.mxu0 %vm1928_vm3, %v1926_v20  ;;  %1677 = vmatpush3.msra.mxu0 %v419_v29 }
 0x322   :  { %1793 = vmatprep.subr.bf16.mxu0 %v1927_v24 }
 0x3f3   :  { %v507_v0 = vpop.f32.mrb[2].mxu0 }
 0x3f4   :  { %v508_v1 = vadd.f32 %v507_v0, %v2125_v63  ;;  %v1668_v2 = vpop.f32.mrb[3].mxu0 }
 0x3f6   :  { %v511_v3 = vsel %vm157_vm5, %v508_v1, -inf }
 0x3f7   :  { %512 = vmax.xlane.f32.xlu0 %v511_v3 }
 0x40d   :  { %1839 = vrot.lane.b32.xlu0 %v2108_v57, %s1930_s7 }
 0x411   :  { %676 = vrot.lane.b32.xlu0 %v2116_v59, %s1931_s2 }
 0x415   :  { %923 = vrot.lane.b32.xlu0 %v2116_v59, %s1932_s4 }
 0x484   :  { %v513_v4 = vpop.xlane.xlu0 %512 }
 0x485   :  { %v514_v5 = vsub.f32 %v508_v1, %v513_v4 }
 0x487   :  { %v515_v6 = vmul.f32 1.442695, %v514_v5  ;;  %v420_v5 = vld [vmem:[%s2248_s10 + $0x8] sm:$0xff] }
 0x488   :  { %v1840_v7 = vpop.permute.xlu0 %1839 }
 0x489   :  { %1873 = vpow2.f32 %v515_v6  ;;  %v1842_v8 = vunpack.i.h.bf16 %v1840_v7  ;;  %v1841_v9 = vunpack.i.l.bf16 %v1840_v7 }
 0x48b   :  { %v1787_v10 = vpack.c.bf16 %v1842_v8, %v1841_v9 }
 0x48c   :  { %v677_v26 = vpop.permute.xlu0 %676 }
 0x48d   :  { %1788 = vmatpush3.bf16.msra.mxu1 %v1787_v10 }
 0x48e   :  { %1789 = vmatprep.subr.bf16.mxu1 %v1927_v24 }
 0x490   :  { %v924_v28 = vpop.permute.xlu0 %923 }
 0x493   :  { %v1874_v11 = vpop.eup %1873 }
 0x494   :  { %v517_v12 = vsel %vm157_vm5, %v1874_v11, 0.0 }
 0x495   :  { %518 = vadd.xlane.f32.xlu1 %v517_v12 }
 0x4a6   :  { %1844 = vrot.lane.b32.xlu1 %v2108_v57, %s1931_s2 }
 0x4aa   :  { %1849 = vrot.lane.b32.xlu1 %v2108_v57, %s1932_s4 }
 0x522   :  { %v519_v13 = vpop.xlane.xlu1 %518 }
 0x523   :  { %1875 = vrcp.f32 %v519_v13 }
 0x526   :  { %v1845_v14 = vpop.permute.xlu1 %1844 }
 0x527   :  { %v1847_v15 = vunpack.i.h.bf16 %v1845_v14  ;;  %v1846_v16 = vunpack.i.l.bf16 %v1845_v14 }
 0x529   :  { %v1790_v21 = vpack.c.bf16 %v1847_v15, %v1846_v16 }
 0x52a   :  { %v1850_v22 = vpop.permute.xlu1 %1849 }
 0x52b   :  { %v1852_v23 = vunpack.i.h.bf16 %v1850_v22  ;;  %v1851_v25 = vunpack.i.l.bf16 %v1850_v22  ;;  %v421_v22 = vld [vmem:[%s2248_s10 + $0x10] sm:$0xff] }
 0x52d   :  { %v1876_v17 = vpop.eup %1875  ;;  %v1797_v27 = vpack.c.bf16 %v1852_v23, %v1851_v25 }
 0x52e   :  { %v521_v19 = vmul.f32 %v1876_v17, %v1874_v11 }
 0x530   :  { %1674 = vmatmul.mubr.msk.f32.vlgmr.msra.gmra.mrb[6].mxu1 %vm157_vm5, %v521_v19 }
 0x531   :  { %1792 = vmatpush3.bf16.xpose.msk.msra.mxu1 %vm2104_vm8, %v1790_v21  ;;  %1685 = vmatprep.mubr.msk.f32.mxu1 %vm1928_vm3, %v1926_v20 }
 0x532   :  { %1796 = vmatprep.subr.bf16.mxu1 %v1927_v24 }
 0x538   :  { %1686 = vmatmul.mubr.msk.f32.vlgmr.msra.gmra.mrb[8].mxu1 %vm431_vm7, %v677_v26 }
 0x539   :  { %1799 = vmatpush3.bf16.xpose.msk.msra.mxu1 %vm2104_vm8, %v1797_v27  ;;  %1704 = vmatprep.mubr.msk.f32.mxu1 %vm1928_vm3, %v1926_v20 }
 0x53a   :  { %1803 = vmatprep.subr.bf16.mxu1 %v1927_v24 }
 0x540   :  { %1705 = vmatmul.mubr.msk.f32.vlgmr.msra.gmra.mrb[10].mxu1 %vm431_vm7, %v924_v28 }
 0x541   :  { %1723 = vmatprep.mubr.msk.f32.mxu1 %vm1928_vm3, %v1926_v20 }
 0x603   :  { %v597_v30 = vpop.f32.mrb[6].mxu1 }
 0x604   :  { %1877 = vtanh.f32 %v597_v30  ;;  %v1675_v31 = vpop.f32.mrb[7].mxu1 }
 0x60b   :  { %v754_v32 = vpop.f32.mrb[8].mxu1 }
 0x60c   :  { %v755_v33 = vadd.f32 %v754_v32, %v2125_v63  ;;  %v1687_v34 = vpop.f32.mrb[9].mxu1 }
 0x60d   :  { %v1417_v34 = vld [vmem:[%s2250_s12] sm:$0xff] }
 0x60e   :  { %v1878_v35 = vpop.eup %1877  ;;  %v758_v36 = vsel %vm157_vm5, %v755_v33, -inf }
 0x60f   :  { %759 = vmax.xlane.f32.xlu1 %v758_v36  ;;  %1679 = vmatmul.mubr.msk.f32.vlgmr.msra.gmra.mrb[4].mxu0 %vm431_vm7, %v1878_v35  ;;  %v1418_v35 = vld [vmem:[%s2250_s12 + $0x8] sm:$0xff] }
 0x610   :  { %1692 = vmatprep.mubr.msk.f32.mxu0 %vm1928_vm3, %v1926_v20  ;;  %v1811_v36 = vpack.c.bf16 %v1418_v35, %v1417_v34 }
 0x613   :  { %v1001_v37 = vpop.f32.mrb[10].mxu1 }
 0x614   :  { %v1706_v38 = vpop.f32.mrb[11].mxu1  ;;  %v1002_v49 = vadd.f32 %v1001_v37, %v2125_v63 }
 0x616   :  { %v1005_v50 = vsel %vm157_vm5, %v1002_v49, -inf }
 0x620   :  { %1859 = vrot.lane.b32.xlu1 %v2108_v57, %s1933_s15 }
 0x624   :  { %1170 = vrot.lane.b32.xlu1 %v2116_v59, %s1933_s15 }
 0x69c   :  { %v760_v39 = vpop.xlane.xlu1 %759 }
 0x69d   :  { %v761_v40 = vsub.f32 %v755_v33, %v760_v39  ;;  %v422_v33 = vld [vmem:[%s2248_s10 + $0x18] sm:$0xff]  ;;  %v1419_v39 = vld [vmem:[%s2250_s12 + $0x10] sm:$0xff] }
 0x69f   :  { %v762_v41 = vmul.f32 1.442695, %v761_v40  ;;  %v1420_v40 = vld [vmem:[%s2250_s12 + $0x18] sm:$0xff] }
 0x6a0   :  { %v1860_v42 = vpop.permute.xlu1 %1859 }
 0x6a1   :  { %1879 = vpow2.f32 %v762_v41  ;;  %v1862_v43 = vunpack.i.h.bf16 %v1860_v42  ;;  %v1861_v44 = vunpack.i.l.bf16 %v1860_v42  ;;  %v1814_v41 = vpack.c.bf16 %v1420_v40, %v1419_v39 }
 0x6a3   :  { %v1804_v45 = vpack.c.bf16 %v1862_v43, %v1861_v44 }
 0x6a4   :  { %v1171_v47 = vpop.permute.xlu1 %1170 }
 0x6a5   :  { %1806 = vmatpush3.bf16.xpose.msk.msra.mxu1 %vm2104_vm8, %v1804_v45 }
 0x6a6   :  { %1810 = vmatprep.subr.bf16.mxu1 %v1927_v24 }
 0x6ab   :  { %v1880_v46 = vpop.eup %1879 }
 0x6ac   :  { %1724 = vmatmul.mubr.msk.f32.vlgmr.msra.gmra.mrb[12].mxu1 %vm431_vm7, %v1171_v47  ;;  %v764_v48 = vsel %vm157_vm5, %v1880_v46, 0.0 }
 0x6ad   :  { %765 = vadd.xlane.f32.xlu0 %v764_v48  ;;  %1746 = vmatprep.mubr.msk.f32.mxu1 %vm1928_vm3, %v1926_v20 }
 0x6ae   :  { %1812 = vmatpush3.bf16.msra.mxu1 %v1811_v36 }
 0x6af   :  { %1813 = vmatprep.subr.bf16.mxu1 %v1927_v24 }
 0x6b2   :  { %1815 = vmatpush3.bf16.msra.mxu1 %v1814_v41 }
 0x6c3   :  { %1854 = vrot.lane.b32.xlu0 %v2108_v57, %s1934_s16 }
 0x6e2   :  { %1006 = vmax.xlane.f32.xlu0 %v1005_v50 }
 0x6f8   :  { %1864 = vrot.lane.b32.xlu0 %v2108_v57, %s1935_s17 }
 0x73a   :  { %v766_v51 = vpop.xlane.xlu0 %765 }
 0x73b   :  { %1881 = vrcp.f32 %v766_v51 }
 0x73e   :  { %v1855_v52 = vpop.permute.xlu0 %1854 }
 0x73f   :  { %v1857_v53 = vunpack.i.h.bf16 %v1855_v52  ;;  %v1856_v54 = vunpack.i.l.bf16 %v1855_v52 }
 0x741   :  { %v1794_v55 = vpack.c.bf16 %v1857_v53, %v1856_v54 }
 0x743   :  { %1795 = vmatpush3.bf16.msra.mxu0 %v1794_v55 }
 0x744   :  { %1695 = vmatprep.subr.mxu0 %v1926_v20 }
 0x745   :  { %v1882_v56 = vpop.eup %1881 }
 0x746   :  { %v768_v58 = vmul.f32 %v1882_v56, %v1880_v46 }
 0x748   :  { %1693 = vmatmul.mubr.msk.f32.vlgmr.msra.gmra.mrb[6].mxu0 %vm157_vm5, %v768_v58 }
 0x749   :  { %1697 = vmatprep.mubr.msk.f32.mxu0 %vm1928_vm3, %v1926_v20  ;;  %1696 = vmatpush3.msra.mxu0 %v420_v5 }
 0x74a   :  { %1800 = vmatprep.subr.bf16.mxu0 %v1927_v24 }
 0x76f   :  { %v1007_v59 = vpop.xlane.xlu0 %1006 }
 0x770   :  { %v1008_v60 = vsub.f32 %v1002_v49, %v1007_v59 }
 0x772   :  { %v1009_v61 = vmul.f32 1.442695, %v1008_v60 }
 0x773   :  { %v1865_v11 = vpop.permute.xlu0 %1864 }
 0x774   :  { %1883 = vpow2.f32 %v1009_v61  ;;  %v1867_v14 = vunpack.i.h.bf16 %v1865_v11  ;;  %v1866_v15 = vunpack.i.l.bf16 %v1865_v11 }
 0x776   :  { %v1801_v19 = vpack.c.bf16 %v1867_v14, %v1866_v15 }
 0x77e   :  { %v1884_v62 = vpop.eup %1883 }
 0x77f   :  { %v1248_v0 = vpop.f32.mrb[12].mxu1  ;;  %v1011_v1 = vsel %vm157_vm5, %v1884_v62, 0.0 }
 0x780   :  { %v1249_v2 = vadd.f32 %v1248_v0, %v2125_v63  ;;  %1012 = vadd.xlane.f32.xlu1 %v1011_v1  ;;  %v1725_v3 = vpop.f32.mrb[13].mxu1 }
 0x782   :  { %v1252_v4 = vsel %vm157_vm5, %v1249_v2, -inf }
 0x784   :  { %1253 = vmax.xlane.f32.xlu1 %v1252_v4 }
 0x80d   :  { %v1013_v6 = vpop.xlane.xlu1 %1012 }
 0x811   :  { %v1254_v7 = vpop.xlane.xlu1 %1253 }
 0x812   :  { %v1255_v8 = vsub.f32 %v1249_v2, %v1254_v7 }
 0x814   :  { %v1256_v9 = vmul.f32 1.442695, %v1255_v8 }
 0x816   :  { %1885 = vpow2.f32 %v1256_v9 }
 0x817   :  { %1887 = vrcp.f32 %v1013_v6 }
 0x81b   :  { %v844_v10 = vpop.f32.mrb[6].mxu0 }
 0x81c   :  { %1889 = vtanh.f32 %v844_v10  ;;  %v1694_v63 = vpop.f32.mrb[7].mxu0 }
 0x820   :  { %v1886_v12 = vpop.eup %1885 }
 0x821   :  { %v1258_v13 = vsel %vm157_vm5, %v1886_v12, 0.0  ;;  %v1888_v16 = vpop.eup %1887 }
 0x822   :  { %1259 = vadd.xlane.f32.xlu1 %v1258_v13  ;;  %v1015_v21 = vmul.f32 %v1888_v16, %v1884_v62 }
 0x826   :  { %v1890_v17 = vpop.eup %1889 }
 0x827   :  { %1698 = vmatmul.mubr.msk.f32.vlgmr.msra.gmra.mrb[4].mxu0 %vm431_vm7, %v1890_v17 }
 0x828   :  { %1802 = vmatpush3.bf16.msra.mxu0 %v1801_v19  ;;  %1711 = vmatprep.mubr.msk.f32.mxu0 %vm1928_vm3, %v1926_v20 }
 0x829   :  { %1714 = vmatprep.subr.mxu0 %v1926_v20 }
 0x82b   :  { %1712 = vmatmul.mubr.msk.f32.vlgmr.msra.gmra.mrb[8].mxu0 %vm157_vm5, %v1015_v21 }
 0x82c   :  { %1716 = vmatprep.mubr.msk.f32.mxu0 %vm1928_vm3, %v1926_v20  ;;  %1715 = vmatpush3.msra.mxu0 %v421_v22 }
 0x82d   :  { %1807 = vmatprep.subr.bf16.mxu0 %v1927_v24  ;;  %v1531_v24 = vld [vmem:[%s2249_s11] ss:$0 sm:$0xff]  ;;  %s1937_s11 = smov [#allocation2]  }
 0x82e   :  { %s1514_s12 = sshll.u32 %s1937_s11, 4  ;;  %s1515_s12 = int_to_ptr.vmem [resolvable:$true] %s1514_s12 }
 0x82f   :  { %s1901_s29 = scalar_lea.vmem %s1515_s12, 128  ;;  %p1906_p1 = scmp.lt.s32.totalorder %s1515_s12, %s1515_s12 }
 0x830   :  { %p1902_p0 = scmp.ne.s32.totalorder %s1515_s12, %s1901_s29  ;;  %p1907_p2 = scmp.lt.s32.totalorder %s1901_s29, %s1901_s29 }
 0x832   :  { %p1908_p3 = por %p1907_p2, %p1906_p1 }
 0x833   :  { %1869 = vrot.lane.b32.xlu1 %v2108_v57, %s1936_s19 }
 0x834   :  { %p1909_p4 = pnand %p1908_p3, %p1902_p0 }
 0x8af   :  { %v1260_v23 = vpop.xlane.xlu1 %1259 }
 0x8b0   :  { %1891 = vrcp.f32 %v1260_v23 }
 0x8b3   :  { %v1870_v27 = vpop.permute.xlu1 %1869 }
 0x8b4   :  { %v1872_v28 = vunpack.i.h.bf16 %v1870_v27  ;;  %v1871_v29 = vunpack.i.l.bf16 %v1870_v27 }
 0x8b6   :  { %v1808_v32 = vpack.c.bf16 %v1872_v28, %v1871_v29 }
 0x8ba   :  { %v1892_v30 = vpop.eup %1891 }
 0x8bb   :  { %v1262_v57 = vmul.f32 %v1892_v30, %v1886_v12 }
 0x8fe   :  { %v1091_v25 = vpop.f32.mrb[8].mxu0 }
 0x8ff   :  { %1893 = vtanh.f32 %v1091_v25  ;;  %v1713_v26 = vpop.f32.mrb[9].mxu0 }
 0x909   :  { %v1894_v31 = vpop.eup %1893 }
 0x90a   :  { %1717 = vmatmul.mubr.msk.f32.vlgmr.msra.gmra.mrb[4].mxu0 %vm431_vm7, %v1894_v31 }
 0x90b   :  { %1809 = vmatpush3.bf16.msra.mxu0 %v1808_v32  ;;  %1730 = vmatprep.mubr.msk.f32.mxu0 %vm1928_vm3, %v1926_v20 }
 0x90c   :  { %1733 = vmatprep.subr.mxu0 %v1926_v20 }
 0x90e   :  { %1731 = vmatmul.mubr.msk.f32.vlgmr.msra.gmra.mrb[10].mxu0 %vm157_vm5, %v1262_v57 }
 0x90f   :  { %1735 = vmatprep.mubr.msk.f32.mxu0 %vm1928_vm3, %v1926_v20  ;;  %1734 = vmatpush3.msra.mxu0 %v422_v33 }
 0x9e1   :  { %v1338_v37 = vpop.f32.mrb[10].mxu0 }
 0x9e2   :  { %1895 = vtanh.f32 %v1338_v37  ;;  %v1732_v20 = vpop.f32.mrb[11].mxu0 }
 0x9ec   :  { %v1896_v38 = vpop.eup %1895 }
 0x9ed   :  { %1736 = vmatmul.mubr.msk.f32.vlgmr.msra.gmra.mrb[4].mxu0 %vm431_vm7, %v1896_v38 }
 0xac0   :  { %v1412_v42 = vpop.f32.mrb[4].mxu0 }
 0xac1   :  { %v1816_v43 = vadd.f32 %v1531_v24, %v1412_v42  ;;  %v1737_v44 = vpop.f32.mrb[5].mxu0 }
 0xac3   :  { %1747 = vmatmul.mubr.msk.f32.vlgmr.msra.gmra.mrb[14].mxu1 %vm242_vm6, %v1816_v43 }
 0xb96   :  { %v1490_v45 = vpop.f32.mrb[14].mxu1 }
 0xb97   :  { %v1495_v46 = vsel %vm1494_vm10, %v1490_v45, -1e+30  ;;  %v1748_v47 = vpop.f32.mrb[15].mxu1 }
 0xb98   :  { %1496 = vmax.xlane.f32.xlu0 %v1495_v46 }
 0xc25   :  { %v1497_v48 = vpop.xlane.xlu0 %1496 }
 0xc26   :  { %v1498_v49 = vsub.f32 %v1495_v46, %v1497_v48 }
 0xc28   :  { %v1499_v50 = vmul.f32 1.442695, %v1498_v49 }
 0xc2a   :  { %1897 = vpow2.f32 %v1499_v50 }
 0xc34   :  { %v1898_v51 = vpop.eup %1897 }
 0xc35   :  { %1501 = vadd.xlane.f32.xlu1 %v1898_v51 }
 0xcc2   :  { %v1502_v52 = vpop.xlane.xlu1 %1501 }
 0xcc3   :  { %1899 = vlog2.f32 %v1502_v52 }
 0xccd   :  { %v1900_v53 = vpop.eup %1899 }
 0xcce   :  { %v1504_v54 = vmul.f32 0.6931472, %v1900_v53 }
 0xcd0   :  { %v1505_v55 = vadd.f32 %v1504_v54, %v1497_v48 }
 0xcd2   :  { %v1506_v56 = vsub.f32 %v1495_v46, %v1505_v55 }
 0xcd4   :  { %1507 = vst [vmem:[#allocation2] sm:$0xff] %v1506_v56 }
 0xcd5   :  { %1912 = shalt.err (!%p1909_p4)
}
 0xcd6   :  { %s1913_s7 = scalar_lea.hbm %s2251_s13, 128 }
 0xcd7   :  { %p1914_p5 = scmp.ne.s32.totalorder %s2251_s13, %s1913_s7  ;;  %p1917_p6 = scmp.lt.u32.totalorder %s1913_s7, %s2251_s13 }
 0xcd9   :  { %p1919_p7 = pnand %p1917_p6, %p1914_p5 }
 0xcdb   :  { %1922 = shalt.err (!%p1919_p7)
}
 0xcdc   :  { %1517 = dma.vmem_to_hbm [thread:$0]  %s1515_s12, 128, %s2251_s13, [#allocation3]  }
 0xcdd   :  { %1923 = dma.done.wait [#allocation3], 128  }
 0xcde   :  { %1924 = vsyncadd [#allocation3], 4294967168 }
 0xcdf   :  { %1521 = vsyncpa [#allocation3], 1 }

</bundles_post_ra>
